<compile_context>
chip_gen: v6e
topology: v6e:2x2x1
jax: 0.10.0
libtpu: 0.0.40
codegen_flags: <defaults>
</compile_context>

<pallas_src>
import functools
import math

import jax
import jax.numpy as jnp
import numpy as np
from jax.experimental import pallas as pl
from jax.experimental.pallas import tpu as pltpu


def _rope_kernel(x_ref, cos_ref, sin_ref, o_ref, *, half):
    """Apply half-split RoPE to one tile.

    x_ref is (rows, DL) in 2-D mode or (seq, HG, DL) in 3-D mode.
    cos_ref / sin_ref are (rows, DL) / (seq, DL); the sin table carries the sign
    (-sin on first-half slots of every D-chunk, +sin on second-half slots).
    """
    x = x_ref[...].astype(jnp.float32)          # math in f32, cast on store
    cos = cos_ref[...]
    sin = sin_ref[...]
    if x.ndim == cos.ndim + 1:                  # 3-D mode: broadcast over head groups
        cos = cos[:, None, :]
        sin = sin[:, None, :]
    ax = x.ndim - 1
    lanes = x.shape[ax]
    d = 2 * half
    if lanes == d:
        # One head chunk per lane vector (g == 1): a single wrap-around roll is exact.
        rot = pltpu.roll(x, shift=half, axis=ax)
    else:
        # g > 1 head chunks folded into lanes: two XLU rolls plus a lane select so
        # chunk-boundary wrap values never reach the output (no NaN/Inf leakage).
        x2_at_lo = pltpu.roll(x, shift=lanes - half, axis=ax)   # x[..., i] <- x[..., i + half]
        x1_at_hi = pltpu.roll(x, shift=half, axis=ax)           # x[..., i] <- x[..., i - half]
        lane = jax.lax.broadcasted_iota(jnp.int32, x.shape, ax)
        rot = jnp.where(lane % d < half, x2_at_lo, x1_at_hi)
    o_ref[...] = (x * cos + rot * sin).astype(o_ref.dtype)


def _sublane_min(dtype) -> int:
    """Sublane packing minimum: 8 for f32, 16 for bf16, 32 for int8/fp8."""
    return max(8, 32 // jnp.dtype(dtype).itemsize)


def _vmem_capacity_bytes() -> int:
    try:
        info = pltpu.get_tpu_info()
        return int(getattr(info, "vmem_capacity_bytes", 64 * 1024 * 1024))
    except Exception:
        return 64 * 1024 * 1024     # conservative default (v7x per-TensorCore)


def rope_pallas(x, cos_t, sin_t, *, g):
    """x: (B, S, Hp, D) with Hp % g == 0.  cos_t/sin_t: f32 tables, width g*D."""
    B, S, Hp, D = x.shape
    half = D // 2
    HG = Hp // g
    DL = g * D
    itemsize = jnp.dtype(x.dtype).itemsize
    min_sub = _sublane_min(x.dtype)
    mode_2d = HG < min_sub

    if mode_2d:
        # Merge S and HG into a single sublane-dense row axis (free reshape).
        xf = x.reshape(B, S * HG, DL)
        total_rows = S * HG
        x_row_bytes = DL * itemsize
    else:
        xf = x.reshape(B, S, HG, DL)
        total_rows = S
        hg_pad = pl.cdiv(HG, min_sub) * min_sub
        x_row_bytes = hg_pad * DL * itemsize

    if cos_t.shape[0] < total_rows or cos_t.shape[1] != DL:
        raise ValueError("cos/sin tables do not match the chosen layout")

    # ---- dtype-aware VMEM budgeting: (in + out) tiles + 2 tables, double-buffered.
    tab_row_bytes = DL * 4                           # tables are f32
    per_row_ws = 2 * 2 * x_row_bytes + 2 * 2 * tab_row_bytes
    vmem_cap = _vmem_capacity_bytes()
    budget = min(vmem_cap // 4, 48 * 1024 * 1024)    # per-generation working-set budget
    tile_rows = (budget // per_row_ws) // min_sub * min_sub
    tile_rows = max(min_sub, tile_rows)
    tile_rows = min(tile_rows, total_rows)
    if tile_rows % 8 != 0 and cos_t.shape[0] != tile_rows:
        # Keep the table block (sublane dim) legal: equal to its full dim.
        cos_t = cos_t[:tile_rows]
        sin_t = sin_t[:tile_rows]
    n_tiles = pl.cdiv(total_rows, tile_rows)

    vmem_limit = min(int(0.9 * vmem_cap),
                     max(int(per_row_ws * tile_rows * 1.5) + (2 << 20), 16 << 20))

    x_bytes = xf.size * itemsize
    tab_bytes = 2 * total_rows * DL * 4              # read once per row tile, reused over batch
    cost = pl.CostEstimate(flops=4 * xf.size, transcendentals=0,
                           bytes_accessed=int(2 * x_bytes + tab_bytes))

    if mode_2d:
        in_specs = [
            pl.BlockSpec((None, tile_rows, DL), lambda ri, b: (b, ri, 0)),
            pl.BlockSpec((tile_rows, DL), lambda ri, b: (ri, 0)),
            pl.BlockSpec((tile_rows, DL), lambda ri, b: (ri, 0)),
        ]
        out_spec = pl.BlockSpec((None, tile_rows, DL), lambda ri, b: (b, ri, 0))
        out_shape = jax.ShapeDtypeStruct((B, S * HG, DL), x.dtype)
    else:
        in_specs = [
            pl.BlockSpec((None, tile_rows, HG, DL), lambda si, b: (b, si, 0, 0)),
            pl.BlockSpec((tile_rows, DL), lambda si, b: (si, 0)),
            pl.BlockSpec((tile_rows, DL), lambda si, b: (si, 0)),
        ]
        out_spec = pl.BlockSpec((None, tile_rows, HG, DL), lambda si, b: (b, si, 0, 0))
        out_shape = jax.ShapeDtypeStruct((B, S, HG, DL), x.dtype)

    out = pl.pallas_call(
        functools.partial(_rope_kernel, half=half),
        out_shape=out_shape,
        grid_spec=pltpu.PrefetchScalarGridSpec(
            num_scalar_prefetch=0,
            # batch is the fastest-varying grid axis -> cos/sin tiles are fetched
            # once per row tile and reused across all batch elements.
            grid=(n_tiles, B),
            in_specs=in_specs,
            out_specs=out_spec,
        ),
        compiler_params=pltpu.CompilerParams(
            dimension_semantics=("parallel", "parallel"),   # megacore sharding
            vmem_limit_bytes=int(vmem_limit),
        ),
        cost_estimate=cost,
    )(xf, cos_t, sin_t)

    return out.reshape(B, S, Hp, D)


class LegacyRotaryPositionalEmbeddings:
    """Pallas-TPU port of the PyTorch module (half-split RoPE on [B, S, H, D])."""

    def __init__(self, dim: int, max_seq_len: int = 2048, base: int = 10000):
        self.dim = dim
        self.max_seq_len = max_seq_len
        self.base = base
        self.inv_freq = 1.0 / (base ** (jnp.arange(0, dim, 2, dtype=jnp.float32) / dim))
        # TODO(synk): the PyTorch module keys its cos/sin cache on (device, dtype) and
        # computes the tables in x.dtype; here tables are cached per lane layout in
        # float32 (kernel math runs in f32 and casts on the store).
        self._cache = {}   # (g, row_repeat) -> (cached_seq_len, cos_t, sin_t)

    def _update_tables(self, seq_len: int, g: int, row_repeat: int):
        key = (g, row_repeat)
        cached_len = self._cache[key][0] if key in self._cache else 0
        if seq_len > cached_len:
            t = jnp.arange(seq_len, dtype=jnp.float32)
            freqs = jnp.outer(t, self.inv_freq)                       # (seq_len, dim // 2)
            c, s = jnp.cos(freqs), jnp.sin(freqs)
            cos_t = jnp.tile(jnp.concatenate([c, c], axis=-1), (1, g))      # (seq_len, g*D)
            sin_t = jnp.tile(jnp.concatenate([-s, s], axis=-1), (1, g))     # signed sin
            if row_repeat > 1:
                cos_t = jnp.repeat(cos_t, row_repeat, axis=0)
                sin_t = jnp.repeat(sin_t, row_repeat, axis=0)
            self._cache[key] = (seq_len, cos_t, sin_t)
        _, cos_t, sin_t = self._cache[key]
        # Tables may be longer than needed; the BlockSpec only touches the rows it
        # indexes, so no per-call slice (extra HBM traffic) is required.
        return cos_t, sin_t

    def __call__(self, x):
        B, S, H, D = x.shape
        if D != self.dim:
            raise ValueError(f"head_dim {D} does not match module dim {self.dim}")
        if D % 2 != 0:
            raise ValueError("head_dim must be even for rotary embeddings")

        # Fold g heads into the lane dim so the trailing dim is a multiple of 128.
        g = 128 // math.gcd(D, 128)
        pad_h = (-H) % g
        if pad_h:
            # Pad heads so stores stay lane-dense instead of falling back to
            # masked (lane-sparse) partial stores with last dim < 128.
            x_in = jnp.pad(x, ((0, 0), (0, 0), (0, pad_h), (0, 0)))
        else:
            x_in = x
        Hp = H + pad_h
        HG = Hp // g
        mode_2d = HG < _sublane_min(x.dtype)
        row_repeat = HG if (mode_2d and HG > 1) else 1

        cos_t, sin_t = self._update_tables(S, g, row_repeat)
        out = rope_pallas(x_in, cos_t, sin_t, g=g)
        if pad_h:
            out = out[:, :, :H, :]
        return out


def _reference(x, base=10000):
    """Pure-JAX mirror of the PyTorch forward (slice-halves formulation)."""
    B, S, H, D = x.shape
    half = D // 2
    inv_freq = 1.0 / (base ** (jnp.arange(0, D, 2, dtype=jnp.float32) / D))
    freqs = jnp.outer(jnp.arange(S, dtype=jnp.float32), inv_freq)
    cos = jnp.concatenate([jnp.cos(freqs)] * 2, axis=-1)[None, :, None, :]
    sin = jnp.concatenate([jnp.sin(freqs)] * 2, axis=-1)[None, :, None, :]
    xf = x.astype(jnp.float32)
    x1, x2 = xf[..., :half], xf[..., half:]
    out = jnp.concatenate(
        [x1 * cos[..., :half] - x2 * sin[..., half:],
         x2 * cos[..., half:] + x1 * sin[..., :half]], axis=-1)
    return out.astype(x.dtype)


if __name__ == "__main__":
    key = jax.random.PRNGKey(0)
    configs = [
        (2, 8, 4, 32),     # HG == 1 -> 2-D sublane-dense layout, folded-head two-roll path
        (2, 8, 16, 128),   # g == 1  -> single-roll fast path, 3-D layout
        (2, 8, 5, 32),     # H % g != 0 -> head padding keeps stores lane-dense
    ]
    for i, (B, S, H, D) in enumerate(configs):
        rope = LegacyRotaryPositionalEmbeddings(dim=D, max_seq_len=64)
        k = jax.random.fold_in(key, i)
        x = jax.random.normal(k, (B, S, H, D), dtype=jnp.float32)
        out = jax.block_until_ready(rope(x))
        ref = _reference(x, base=rope.base)
        np.testing.assert_allclose(np.asarray(out), np.asarray(ref), rtol=1e-5, atol=1e-5)
    print("KERNEL_OK")
</pallas_src>

<mosaic_0001>
module attributes {stable_mosaic.version = 11 : i64} {
  func.func @_rope_kernel(%arg0: i32, %arg1: i32, %arg2: memref<1x8x128xf32, #tpu.memory_space<vmem>>, %arg3: memref<8x128xf32, #tpu.memory_space<vmem>>, %arg4: memref<8x128xf32, #tpu.memory_space<vmem>>, %arg5: memref<1x8x128xf32, #tpu.memory_space<vmem>>) attributes {dimension_semantics = [#tpu.dimension_semantics<parallel>, #tpu.dimension_semantics<parallel>], iteration_bounds = array<i64: 1, 2>, scalar_prefetch = 0 : i64, scratch_operands = 0 : i64, tpu.core_type = #tpu.core_type<tc>, window_params = [{transform_indices = @transform_0, window_bounds = array<i64: 1, 8, 128>}, {transform_indices = @transform_1, window_bounds = array<i64: 8, 128>}, {transform_indices = @transform_2, window_bounds = array<i64: 8, 128>}, {transform_indices = @transform_3, window_bounds = array<i64: 1, 8, 128>}]} {
    %c0 = arith.constant 0 : index
    %c0_0 = arith.constant 0 : index
    %c0_1 = arith.constant 0 : index
    %0 = vector.load %arg2[%c0, %c0_0, %c0_1] : memref<1x8x128xf32, #tpu.memory_space<vmem>>, vector<1x8x128xf32>
    %1 = vector.shape_cast %0 : vector<1x8x128xf32> to vector<8x128xf32>
    %c0_2 = arith.constant 0 : index
    %c0_3 = arith.constant 0 : index
    %2 = vector.load %arg3[%c0_2, %c0_3] : memref<8x128xf32, #tpu.memory_space<vmem>>, vector<8x128xf32>
    %c0_4 = arith.constant 0 : index
    %c0_5 = arith.constant 0 : index
    %3 = vector.load %arg4[%c0_4, %c0_5] : memref<8x128xf32, #tpu.memory_space<vmem>>, vector<8x128xf32>
    %c112_i32 = arith.constant 112 : i32
    %4 = tpu.dynamic_rotate %1 by %c112_i32 dim 1 : vector<8x128xf32>, i32 -> vector<8x128xf32>
    %c16_i32 = arith.constant 16 : i32
    %5 = tpu.dynamic_rotate %1 by %c16_i32 dim 1 : vector<8x128xf32>, i32 -> vector<8x128xf32>
    %6 = tpu.iota {dimensions = array<i32: 1>} : vector<8x128xi32>
    %c32_i32 = arith.constant 32 : i32
    %c0_i32 = arith.constant 0 : i32
    %7 = arith.cmpi eq, %c32_i32, %c0_i32 : i32
    %c1_i32 = arith.constant 1 : i32
    %8 = arith.select %7, %c1_i32, %c32_i32 : i32
    %9 = vector.broadcast %8 : i32 to vector<8x128xi32>
    %10 = arith.remsi %6, %9 : vector<8x128xi32>
    %c0_i32_6 = arith.constant 0 : i32
    %11 = vector.broadcast %c0_i32_6 : i32 to vector<8x128xi32>
    %12 = arith.cmpi ne, %10, %11 : vector<8x128xi32>
    %c0_i32_7 = arith.constant 0 : i32
    %13 = vector.broadcast %c0_i32_7 : i32 to vector<8x128xi32>
    %14 = arith.cmpi slt, %10, %13 : vector<8x128xi32>
    %c0_i32_8 = arith.constant 0 : i32
    %15 = arith.cmpi slt, %8, %c0_i32_8 : i32
    %16 = vector.broadcast %15 : i1 to vector<8x128xi1>
    %17 = vector.broadcast %16 : vector<8x128xi1> to vector<8x128xi1>
    %18 = arith.xori %14, %17 : vector<8x128xi1>
    %19 = arith.andi %18, %12 : vector<8x128xi1>
    %20 = vector.broadcast %8 : i32 to vector<8x128xi32>
    %21 = arith.addi %10, %20 : vector<8x128xi32>
    %22 = arith.select %19, %21, %10 : vector<8x128xi1>, vector<8x128xi32>
    %c16_i32_9 = arith.constant 16 : i32
    %23 = vector.broadcast %c16_i32_9 : i32 to vector<8x128xi32>
    %24 = arith.cmpi slt, %22, %23 : vector<8x128xi32>
    %25 = arith.select %24, %4, %5 : vector<8x128xi1>, vector<8x128xf32>
    %26 = arith.mulf %1, %2 : vector<8x128xf32>
    %27 = arith.mulf %25, %3 : vector<8x128xf32>
    %28 = arith.addf %26, %27 : vector<8x128xf32>
    %c0_10 = arith.constant 0 : index
    %c0_11 = arith.constant 0 : index
    %c0_12 = arith.constant 0 : index
    %29 = vector.load %arg5[%c0_10, %c0_11, %c0_12] : memref<1x8x128xf32, #tpu.memory_space<vmem>>, vector<1x8x128xf32>
    %30 = vector.shape_cast %29 : vector<1x8x128xf32> to vector<8x128xf32>
    %31 = vector.shape_cast %28 : vector<8x128xf32> to vector<1x8x128xf32>
    tpu.vector_store %arg5[%c0_10, %c0_11, %c0_12], %31 {strides = array<i32>} : memref<1x8x128xf32, #tpu.memory_space<vmem>>, vector<1x8x128xf32>,
    return
  }
  func.func @transform_0(%arg0: i32, %arg1: i32) -> (i32, i32, i32) {
    %c0_i32 = arith.constant 0 : i32
    %c0_i32_0 = arith.constant 0 : i32
    return %arg1, %arg0, %c0_i32 : i32, i32, i32
  }
  func.func @transform_1(%arg0: i32, %arg1: i32) -> (i32, i32) {
    %c0_i32 = arith.constant 0 : i32
    %c0_i32_0 = arith.constant 0 : i32
    return %arg0, %c0_i32 : i32, i32
  }
  func.func @transform_2(%arg0: i32, %arg1: i32) -> (i32, i32) {
    %c0_i32 = arith.constant 0 : i32
    %c0_i32_0 = arith.constant 0 : i32
    return %arg0, %c0_i32 : i32, i32
  }
  func.func @transform_3(%arg0: i32, %arg1: i32) -> (i32, i32, i32) {
    %c0_i32 = arith.constant 0 : i32
    %c0_i32_0 = arith.constant 0 : i32
    return %arg1, %arg0, %c0_i32 : i32, i32, i32
  }
}

</mosaic_0001>

<bundles_post_ra>
// kernel: tpu_custom_call.1
= control target key start
LH: loop header
LB: loop body
LE: loop exit
PB: predicated region body
PF: predicated region fallthrough
CT: control target
= control target key end

     0   :  { %8 = vsyncpa [#allocation3], 0  ;;  %s855_s0 = inlined_call_operand.hbm [shape: f32[2,8,128], index: 0, kind: input, shape index: {}]   ;;  %s856_s1 = inlined_call_operand.hbm [shape: f32[8,128], index: 1, kind: input, shape index: {}]   ;;  %s857_s2 = inlined_call_operand.hbm [shape: f32[8,128], index: 2, kind: input, shape index: {}]   ;;  %s858_s3 = inlined_call_operand.hbm [shape: f32[2,8,128], index: 3, kind: output, shape index: {}]  }
   0x1   :  { %10 = vsyncpa [#allocation3 + $0x1], 0 }
   0x2   :  { %11 = vsyncpa [#allocation6], 0 }
   0x3   :  { %12 = vsyncpa [#allocation4], 0 }
   0x4   :  { %14 = vsyncpa [#allocation4 + $0x1], 0  ;;  %s681_s12 = smov 0   ;;  %s683_s13 = smov 0  }
   0x5   :  { %s685_s14 = smov 0   ;;  %s687_s15 = smov 0  }
   0x6   :  { %s689_s16 = smov 0   ;;  %s691_s17 = smov 0  }
   0x7 LB: > { %s387_s18 = sadd.s32 4294967295, %s653_s17   ;;  %s388_s19 = sadd.s32 4294967294, %s653_s17   ;;  %s653_s17 = sphi %s691_s17, %s20_s17   ;;  %s649_s16 = sphi %s689_s16, %s881_s16   ;;  %s645_s15 = sphi %s687_s15, %s880_s15   ;;  %s641_s14 = sphi %s685_s14, %s879_s14   ;;  %s637_s13 = sphi %s683_s13, %s878_s13   ;;  %s633_s12 = sphi %s681_s12, %s877_s12  }
   0x8   : > { %p54_p0 = scmp.ne.s32.totalorder %s637_s13, %s633_s12  ;;  %p715_p1 = scmp.eq.s32.totalorder %s387_s18, 0 }
   0x9   : > { %p719_p2 = scmp.eq.s32.totalorder %s387_s18, 1  ;;  %p138_p3 = scmp.eq.s32.totalorder %s388_s19, 1 }
   0xa   : > { %s863_s20 = scalar_select %p715_p1, 1, 0 }
   0xb   : > { %s864_s21 = scalar_select %p719_p2, 1, 0 }
   0xc   : > { %p725_p4 = por %p715_p1, %p54_p0  ;;  %p389_p5 = scmp.ge.s32.totalorder %s653_s17, 1 }
   0xd   : > { %p730_p6 = por %p138_p3, %p54_p0  ;;  %p145_p7 = scmp.lt.s32.totalorder %s653_s17, 3 }
   0xe   : > { %s865_s22 = scalar_select %p725_p4, 1, 0 }
   0xf   : > { %s866_s23 = scalar_select %p730_p6, 1, 0 }
  0x10   : > { %p735_p8 = pnand %p389_p5, %p145_p7  ;;  %s655_s25 = smov [#allocation5]  }
  0x11   : > { %s160_s26 = sshll.u32 %s655_s25, 4  ;;  %s656_s27 = smov [#allocation7]   ;;  %s161_s26 = int_to_ptr.vmem [resolvable:$true] %s160_s26 }
  0x12   : > { %s867_s24 = scalar_select %p735_p8, 1, 0 }
  0x13   : > { %p416_p10 = pneg %p735_p8  ;;  %s173_s28 = sshll.u32 %s656_s27, 4  ;;  %s174_s28 = int_to_ptr.vmem [resolvable:$true] %s173_s28 }
  0x14   : > { %s500_s30 = scalar_lea.vmem %s161_s26, 128  ;;  %p508_p5 = scmp.lt.s32.totalorder %s161_s26, %s161_s26 }
  0x15   : > { %p744_p11 = pnand %p416_p10, %p715_p1  ;;  %p501_p13 = scmp.ne.s32.totalorder %s161_s26, %s500_s30 }
  0x16   : > { %p509_p7 = scmp.lt.s32.totalorder %s500_s30, %s500_s30 }
  0x17   : > { %p491_p12 = pneg %p744_p11 }
  0x18   : > { %p510_p9 = por %p509_p7, %p508_p5 }
  0x19   : > { %p503_p0 = pnand %p501_p13, %p491_p12 }
  0x1b   : > { %p504_p3 = pneg %p503_p0 }
  0x1d   : > { %p511_p6 = pnand %p510_p9, %p504_p3 }
  0x1f   : > { %514 = shalt.err (!%p511_p6)
}
  0x20   : > { %419 = dma.hbm_to_vmem [thread:$0]  (!%p744_p11), %s856_s1, 128, %s161_s26, [#allocation6]  }
  0x21   : > { %s526_s6 = scalar_lea.vmem %s174_s28, 128  ;;  %p534_p13 = scmp.lt.s32.totalorder %s174_s28, %s174_s28 }
  0x22   : > { %p527_p10 = scmp.ne.s32.totalorder %s174_s28, %s526_s6  ;;  %p535_p0 = scmp.lt.s32.totalorder %s526_s6, %s526_s6 }
  0x24   : > { %p529_p1 = pnand %p527_p10, %p491_p12  ;;  %p536_p8 = por %p535_p0, %p534_p13 }
  0x26   : > { %p530_p4 = pneg %p529_p1 }
  0x28   : > { %p537_p2 = pnand %p536_p8, %p530_p4 }
  0x2a   : > { %540 = shalt.err (!%p537_p2)
}
  0x2b   : > { %422 = dma.hbm_to_vmem [thread:$0]  (!%p744_p11), %s857_s2, 128, %s174_s28, [#allocation6]  }
  0x2c   : > { %s29_s9 = sadd.s32 1, %s649_s16  ;;  %s41_s10 = sadd.s32 1, %s641_s14 }
  0x2d   : > { %p30_p1 = scmp.ge.s32.totalorder %s29_s9, 2  ;;  %p48_p2 = scmp.ne.s32.totalorder %s641_s14, %s637_s13 }
  0x2e   : > { %p49_p4 = scmp.eq.s32.totalorder %s653_s17, 0  ;;  %p433_p6 = scmp.lt.s32.totalorder %s653_s17, 2 }
  0x2f   : > { %s883_s9 = smov (%p30_p1, %s29_s9), 0  ;;  %p869_p9 = scmp.ne.s32.totalorder %s864_s21, 0 }
  0x30   : > { %p50_p8 = por %p49_p4, %p48_p2  ;;  %s36_s18 = ssub.s32 %s649_s16, %s883_s9 }
  0x31   : > { %p776_p12 = por %p869_p9, %p48_p2  ;;  %s184_s19 = sand.u32 1, %s641_s14  }
  0x32   : > { %p39_p3 = scmp.eq.s32.totalorder %s36_s18, 0  ;;  %s393_s25 = sshll.u32 %s184_s19, 3 }
  0x33   : > { %s394_s26 = sshll.u32 %s649_s16, 7  ;;  %s188_s4 = scalar_lea.vmem [#allocation2], %s393_s25 }
  0x34   : > { %s785_s27 = scalar_select %p39_p3, %s641_s14, %s41_s10  }
  0x35   : > { %s194_s30 = scalar_lea.hbm %s855_s0, %s394_s26  ;;  %s196_s5 = sshll.u32 %s188_s4, 4  ;;  %s197_s5 = int_to_ptr.vmem [resolvable:$true] %s196_s5 }
  0x36   : > { %p792_p11 = pnand %p433_p6, %p50_p8  ;;  %s185_s6 = scalar_lea.sflag [#allocation3], %s184_s19 }
  0x37   : > { %s554_s7 = scalar_lea.vmem %s197_s5, 128  ;;  %s657_s8 = smov [#allocation2]  }
  0x38   : > { %p543_p5 = pneg %p792_p11  ;;  %p555_p7 = scmp.ne.s32.totalorder %s197_s5, %s554_s7 }
  0x39   : > { %s559_s10 = sshll.u32 %s657_s8, 4  ;;  %s560_s10 = int_to_ptr.vmem [resolvable:$false] %s559_s10 }
  0x3a   : > { %p557_p10 = pnand %p555_p7, %p543_p5  ;;  %s561_s18 = scalar_lea.vmem %s560_s10, 256 }
  0x3b   : > { %p562_p0 = scmp.lt.s32.totalorder %s197_s5, %s560_s10  ;;  %p563_p1 = scmp.lt.s32.totalorder %s561_s18, %s554_s7 }
  0x3c   : > { %p558_p13 = pneg %p557_p10 }
  0x3d   : > { %p564_p2 = por %p563_p1, %p562_p0 }
  0x3f   : > { %p565_p4 = pnand %p564_p2, %p558_p13 }
  0x41   : > { %568 = shalt.err (!%p565_p4)
}
  0x42   : > { %426 = dma.hbm_to_vmem [thread:$0]  (!%p792_p11), %s194_s30, 128, %s197_s5, %s185_s6  }
  0x43   : > { %p872_p6 = scmp.ne.s32.totalorder %s867_s24, 0 }
  0x44   : > { %s803_s19 = sand.u32 (!%p872_p6), 1, %s637_s13   ;;  %p873_p8 = scmp.ne.s32.totalorder (!%p872_p6), %s865_s22, 0 }
  0x45   : > { %205 = sbr.rel (%p872_p6) target bundleno = 216 (0xd8), region = 32  ;;  %s396_s25 = sshll.u32 (!%p872_p6), %s803_s19, 3 }
  0x46   : > { %s208_s26 = scalar_lea.sflag (!%p872_p6), [#allocation3], %s803_s19  ;;  %s211_s28 = scalar_lea.vmem (!%p872_p6), [#allocation2], %s396_s25 }
  0x4a   : > { %620 = dma.done.wait (%p873_p8), %s208_s26, 128  }
  0x4b   : > { %622 = vsyncadd (%p873_p8), %s208_s26, 4294967168  ;;  %p874_p9 = scmp.ne.s32.totalorder %s863_s20, 0 }
  0x4d   : > { %624 = dma.done.wait (%p874_p9), [#allocation6], 256  }
  0x4e   : > { %626 = vsyncadd (%p874_p9), [#allocation6], 4294967040  ;;  %v242_v0 = vld [vmem:[%s211_s28] sm:$0xff]  ;;  %s658_s24 = smov 112   ;;  %s659_s29 = smov 16   ;;  %v249_v1 = vlaneseq  ;;  %v243_v5 = vld [vmem:[#allocation5] sm:$0xff] }
  0x4f   : > { %245 = vrot.lane.b32.xlu0 %v242_v0, %s658_s24  ;;  %v244_v6 = vld [vmem:[#allocation7] sm:$0xff]  ;;  %v265_v7 = vmul.f32 %v243_v5, %v242_v0  ;;  %s401_s20 = sshll.u32 %s645_s15, 7  ;;  %s241_s22 = scalar_lea.vmem [#allocation8], %s396_s25 }
  0x50   : > { %v250_v2 = vand.u32 127, %v249_v1  ;;  %s284_s30 = sshll.u32 %s241_s22, 4  ;;  %s282_s21 = scalar_lea.hbm %s858_s3, %s401_s20  ;;  %s285_s30 = int_to_ptr.vmem [resolvable:$true] %s284_s30 }
  0x51   : > { %s270_s6 = scalar_lea.sflag [#allocation4], %s803_s19  ;;  %s569_s7 = scalar_lea.vmem %s285_s30, 128 }
  0x52   : > { %v255_v3 = vand.u32 31, %v250_v2  ;;  %p570_p3 = scmp.ne.s32.totalorder %s285_s30, %s569_s7  ;;  %s660_s8 = smov [#allocation8]  }
  0x53   : > { %247 = vrot.lane.b32.xlu0 %v242_v0, %s659_s29  ;;  %s573_s10 = sshll.u32 %s660_s8, 4  ;;  %s574_s10 = int_to_ptr.vmem [resolvable:$false] %s573_s10 }
  0x54   : > { %vm263_vm0 = vcmp.lt.s32.totalorder %v255_v3, 16  ;;  %p571_p11 = pnand %p570_p3, %p776_p12  ;;  %s575_s15 = scalar_lea.vmem %s574_s10, 256 }
  0x55   : > { %p576_p7 = scmp.lt.s32.totalorder %s285_s30, %s574_s10  ;;  %p577_p10 = scmp.lt.s32.totalorder %s575_s15, %s569_s7 }
  0x56   : > { %p572_p5 = pneg %p571_p11 }
  0x57   : > { %p578_p13 = por %p577_p10, %p576_p7 }
  0x59   : > { %p579_p0 = pnand %p578_p13, %p572_p5 }
  0xc1   : > { %v246_v4 = vpop.permute.xlu0 %245 }
  0xc5   : > { %v248_v8 = vpop.permute.xlu0 %247 }
  0xc6   : > { %v264_v9 = vsel %vm263_vm0, %v246_v4, %v248_v8 }
  0xc7   : > { %v266_v10 = vmul.f32 %v264_v9, %v244_v6 }
  0xc9   : > { %v267_v11 = vadd.f32 %v266_v10, %v265_v7 }
  0xcb   : > { %268 = vst [vmem:[%s241_s22] sm:$0xff] %v267_v11 }
  0xcc   : > { %582 = shalt.err (!%p579_p0)
}
  0xcd   : > { %s583_s18 = scalar_lea.hbm %s282_s21, 128  ;;  %s587_s26 = scalar_lea.hbm %s858_s3, 256 }
  0xce   : > { %p584_p1 = scmp.ne.s32.totalorder %s282_s21, %s583_s18  ;;  %p588_p6 = scmp.lt.s32.totalorder %s282_s21, %s858_s3 }
  0xcf   : > { %p589_p8 = scmp.lt.s32.totalorder %s587_s26, %s583_s18 }
  0xd0   : > { %p585_p2 = pnand %p584_p1, %p776_p12 }
  0xd1   : > { %p590_p9 = por %p589_p8, %p588_p6 }
  0xd2   : > { %p586_p4 = pneg %p585_p2 }
  0xd4   : > { %p591_p3 = pnand %p590_p9, %p586_p4 }
  0xd6   : > { %594 = shalt.err (!%p591_p3)
}
  0xd7   : > { %414 = dma.vmem_to_hbm [thread:$0]  (%p776_p12), %s285_s30, 128, %s282_s21, %s270_s6  }
  0xd8 PF: > { %s296_s29 = sand.u32 1, %s633_s12   ;;  %p875_p11 = scmp.ne.s32.totalorder %s866_s23, 0 }
  0xd9   : > { %p876_p5 = scmp.ge.s32.totalorder %s653_s17, 2  ;;  %s297_s20 = scalar_lea.sflag [#allocation4], %s296_s29 }
  0xdb   : > { %p428_p7 = pnand %p876_p5, %p875_p11 }
  0xdd   : > { %p429_p10 = pneg %p428_p7 }
  0xdf   : > { %628 = dma.done.wait (%p429_p10), %s297_s20, 128  }
  0xe0   : > { %630 = vsyncadd (%p429_p10), %s297_s20, 4294967168  ;;  %s20_s17 = sadd.s32 1, %s653_s17   ;;  %s877_s12 = smov %s637_s13 }
  0xe1   : > { %p17_p13 = scmp.ge.s32.totalorder %s20_s17, 4   ;;  %s878_s13 = smov %s641_s14 }
  0xe2   : > { %s879_s14 = smov %s785_s27  ;;  %s880_s15 = smov %s649_s16 }
  0xe3   : > { %s881_s16 = smov %s883_s9  ;;  %19 = sbr.rel (!%p17_p13) target bundleno = 7 (0x7), region = 87 }
  0xe8   :  { %302 = vsyncpa [#allocation3], 1 }
  0xe9   :  { %304 = vsyncpa [#allocation3 + $0x1], 1 }
  0xea   :  { %305 = vsyncpa [#allocation6], 1 }
  0xeb   :  { %306 = vsyncpa [#allocation4], 1 }
  0xec   :  { %308 = vsyncpa [#allocation4 + $0x1], 1 }

</bundles_post_ra>
